<compile_context>
chip_gen: v7x
topology: tpu7x:2x2x1
jax: 0.10.0
libtpu: 0.0.40
codegen_flags: <defaults>
</compile_context>

<pallas_src>
import jax
import jax.numpy as jnp
from jax.experimental import pallas as pl
from jax.experimental.pallas import tpu as pltpu

_NEG = float(jnp.finfo(jnp.float32).min)   # neutral element for max (f32 only)


def _build_kernel(S, T, TS, TSC, n_enc, n_sent, n_seq):
    """All shape parameters are static Python ints (closed over)."""

    def kernel(enc_ref, sent_ref, w1_ref, b1_ref, w2_ref, b2_ref, out_ref, r_ref):
        # enc_ref  : [TB, TS,  M]  encoder tile (streamed along seq grid axis)
        # sent_ref : [TB, TSC, M]  sentiment tile (resident if TSC == T)
        # w1_ref   : [M, M] (in,out), b1_ref: [1, M]
        # w2_ref   : [M, C_pad],      b2_ref: [1, C_pad]  (padded classes ~ -inf)
        # out_ref  : [TB, C_pad]  log-probabilities
        # r_ref    : [TB, M]      running-max accumulator (persists over seq axis)
        j = pl.program_id(1)

        @pl.when(j == 0)
        def _init():
            r_ref[...] = jnp.full_like(r_ref, _NEG)

        def enc_body():
            e = enc_ref[...].astype(jnp.float32)   # upcast after load (v5e-safe bf16 path)
            if S % TS != 0:                        # mask partial last tile (static check)
                pos = j * TS + jax.lax.broadcasted_iota(jnp.int32, e.shape, 1)
                e = jnp.where(pos < S, e, _NEG)
            r_ref[...] = jnp.maximum(r_ref[...], jnp.max(e, axis=1))

        def sent_body():
            s = sent_ref[...].astype(jnp.float32)
            if T % TSC != 0:
                pos = j * TSC + jax.lax.broadcasted_iota(jnp.int32, s.shape, 1)
                s = jnp.where(pos < T, s, _NEG)
            r_ref[...] = jnp.maximum(r_ref[...], jnp.max(s, axis=1))

        if n_enc == n_seq:
            enc_body()
        else:
            pl.when(j < n_enc)(enc_body)

        if n_sent == n_seq:
            sent_body()
        else:
            pl.when(j < n_sent)(sent_body)

        @pl.when(j == n_seq - 1)
        def _finalize():
            r = r_ref[...]                                           # [TB, M]
            # Linear -> (Dropout p=0 identity) -> ReLU
            h = jnp.dot(r, w1_ref[...], preferred_element_type=jnp.float32) + b1_ref[...]
            h = jnp.maximum(h, 0.0)
            # Linear -> LogSoftmax over classes (padded classes: exp() == 0)
            logits = jnp.dot(h, w2_ref[...], preferred_element_type=jnp.float32) + b2_ref[...]
            m = jnp.max(logits, axis=1, keepdims=True)
            shifted = logits - m
            lse = jnp.log(jnp.sum(jnp.exp(shifted), axis=1, keepdims=True))
            out_ref[...] = (shifted - lse).astype(out_ref.dtype)

    return kernel


def _choose_batch_tile(B, max_tile=128):
    max_tile = max(1, min(max_tile, B))
    if B <= max_tile:
        TB = B
    else:
        TB = B
        cand = (max_tile // 8) * 8
        while cand >= 8:
            if B % cand == 0:
                TB = cand
                break
            cand -= 8
    # v7x megacore: keep at least two batch tiles so the second TensorCore gets work.
    if B >= 16 and B // TB < 2:
        cand = (min(max_tile, B // 2) // 8) * 8
        while cand >= 8:
            if B % cand == 0:
                TB = cand
                break
            cand -= 8
    return TB


def _pick_tiles(B, S, T, M, C_pad, enc_itemsize, sent_itemsize, batch_tile):
    # Generation-aware VMEM budget.
    try:
        phys_vmem = int(pltpu.get_tpu_info().vmem_capacity_bytes)
    except Exception:
        phys_vmem = 64 * 1024 * 1024          # conservative: v7x per-TC VMEM
    if phys_vmem >= 128 * 1024 * 1024:        # v5e / v6e
        vmem_limit = 100 * 1024 * 1024
    else:                                     # v7x (64 MiB)
        vmem_limit = 48 * 1024 * 1024

    TB = _choose_batch_tile(B, batch_tile)

    # Resident bytes: weights/biases (budgeted as double-buffered worst case),
    # output block (double-buffered), running-max scratch.
    weight_bytes = 2 * 4 * (M * M + M + M * C_pad + C_pad)
    fixed_bytes = weight_bytes + 2 * TB * C_pad * 4 + TB * M * 4
    avail = max(vmem_limit - fixed_bytes, 2 * 1024 * 1024)
    # TODO(synk): for very large M where W1 alone exceeds VMEM, the finalize matmul
    # would need K-chunking; out of scope here.

    # sentiment_context: resident single block when it fits ~1/3 of the streaming
    # budget (common small-T case), otherwise 8-aligned tiles on the shared seq axis.
    sent_row = 2 * TB * M * sent_itemsize
    if T <= 8 or T * sent_row <= avail // 3:
        TSC = T
    else:
        TSC = max(8, ((avail // 3) // sent_row) // 8 * 8)
        TSC = min(TSC, (T // 8) * 8)
    n_sent = pl.cdiv(T, TSC)

    enc_row = 2 * TB * M * enc_itemsize
    enc_budget = max(avail - TSC * sent_row, 8 * enc_row)
    max_ts = max(8, (enc_budget // enc_row) // 8 * 8)
    TS = S if S <= max_ts else max_ts
    n_enc = pl.cdiv(S, TS)

    needed = fixed_bytes + TSC * sent_row + TS * enc_row + (2 << 20)
    vmem_limit = min(max(vmem_limit, needed), phys_vmem - (4 << 20))

    return TB, TS, n_enc, TSC, n_sent, int(vmem_limit)


def hss_classifier_forward(encoder_hidden_states, sentiment_context,
                           w1, b1, w2, b2, *, batch_tile=128):
    """HSSClassifier forward (ordinal=False, dropout=0).

    encoder_hidden_states: [B, S, M], sentiment_context: [B, T, M] (f32 or bf16)
    w1: [M, M] (in,out), b1: [M] or [1,M], w2: [M, C] (in,out), b2: [C] or [1,C]
    Returns log-probabilities [B, C] (float32).
    """
    B, S, M = encoder_hidden_states.shape
    Bs, T, Ms = sentiment_context.shape
    assert B == Bs and M == Ms
    C = w2.shape[-1]
    f32 = jnp.float32

    # Weights/biases are tiny relative to the streamed activations -> prep in f32.
    w1 = jnp.reshape(w1, (M, M)).astype(f32)
    b1 = jnp.reshape(b1, (1, M)).astype(f32)
    w2 = jnp.reshape(w2, (M, C)).astype(f32)
    b2 = jnp.reshape(b2, (1, C)).astype(f32)

    # Lane-dense class dim: zero weight cols + hugely negative bias for the padding.
    C_pad = ((C + 127) // 128) * 128
    w2p = jnp.zeros((M, C_pad), f32).at[:, :C].set(w2)
    b2p = jnp.full((1, C_pad), -1e30, f32).at[:, :C].set(b2)

    TB, TS, n_enc, TSC, n_sent, vmem_limit = _pick_tiles(
        B, S, T, M, C_pad,
        enc_itemsize=encoder_hidden_states.dtype.itemsize,
        sent_itemsize=sentiment_context.dtype.itemsize,
        batch_tile=batch_tile)
    n_seq = max(n_enc, n_sent)

    kernel = _build_kernel(S, T, TS, TSC, n_enc, n_sent, n_seq)

    if n_enc == n_seq:
        enc_map = lambda i, j: (i, j, 0)
    else:
        enc_map = lambda i, j: (i, jnp.minimum(j, n_enc - 1), 0)
    if n_sent == n_seq:
        sent_map = lambda i, j: (i, j, 0)
    else:
        sent_map = lambda i, j: (i, jnp.minimum(j, n_sent - 1), 0)

    def call(single_buffer_weights):
        wkw = dict(pipeline_mode=pl.Buffered(1)) if single_buffer_weights else {}
        in_specs = [
            pl.BlockSpec((TB, TS, M), enc_map),                      # enc   (streamed)
            pl.BlockSpec((TB, TSC, M), sent_map),                    # sent  (resident / clamped)
            pl.BlockSpec((M, M), lambda i, j: (0, 0), **wkw),        # w1    (resident)
            pl.BlockSpec((1, M), lambda i, j: (0, 0), **wkw),        # b1    (resident)
            pl.BlockSpec((M, C_pad), lambda i, j: (0, 0), **wkw),    # w2    (resident)
            pl.BlockSpec((1, C_pad), lambda i, j: (0, 0), **wkw),    # b2    (resident)
        ]
        return pl.pallas_call(
            kernel,
            out_shape=jax.ShapeDtypeStruct((B, C_pad), f32),
            grid_spec=pltpu.PrefetchScalarGridSpec(
                num_scalar_prefetch=0,
                grid=(B // TB, n_seq),
                in_specs=in_specs,
                out_specs=pl.BlockSpec((TB, C_pad), lambda i, j: (i, 0)),
                scratch_shapes=[pltpu.VMEM((TB, M), f32)],
            ),
            compiler_params=pltpu.CompilerParams(
                dimension_semantics=("parallel", "arbitrary"),
                vmem_limit_bytes=vmem_limit,
            ),
        )(encoder_hidden_states, sentiment_context, w1, b1, w2p, b2p)

    try:
        out_padded = call(True)
    except Exception:
        # Fallback if pipeline_mode=pl.Buffered(1) is unsupported in this jax build.
        out_padded = call(False)

    return out_padded[:, :C]


if __name__ == "__main__":
    # Small shapes consistent with the module's forward.
    batch = 2
    src_len = 8
    trg_len = 8
    memory_bank_size = 32
    num_classes = 4

    key = jax.random.PRNGKey(0)
    k_enc, k_sent, k_w1, k_b1, k_w2, k_b2 = jax.random.split(key, 6)

    encoder_hidden_states = jax.random.normal(
        k_enc, (batch, src_len, memory_bank_size), dtype=jnp.float32)
    sentiment_context = jax.random.normal(
        k_sent, (batch, trg_len, memory_bank_size), dtype=jnp.float32)

    # Deterministic parameter init (Linear weights stored as [in, out] for the kernel).
    scale1 = 1.0 / jnp.sqrt(memory_bank_size)
    w1 = jax.random.uniform(k_w1, (memory_bank_size, memory_bank_size),
                            minval=-scale1, maxval=scale1, dtype=jnp.float32)
    b1 = jax.random.uniform(k_b1, (1, memory_bank_size),
                            minval=-scale1, maxval=scale1, dtype=jnp.float32)
    w2 = jax.random.uniform(k_w2, (memory_bank_size, num_classes),
                            minval=-scale1, maxval=scale1, dtype=jnp.float32)
    b2 = jax.random.uniform(k_b2, (1, num_classes),
                            minval=-scale1, maxval=scale1, dtype=jnp.float32)

    out = hss_classifier_forward(encoder_hidden_states, sentiment_context,
                                 w1, b1, w2, b2)
    out = jax.block_until_ready(out)

    # Pure-JAX reference of the same semantics.
    concat = jnp.concatenate([sentiment_context, encoder_hidden_states], axis=1)
    r_ref = jnp.max(concat, axis=1)
    h_ref = jnp.maximum(r_ref @ w1 + b1, 0.0)
    logits_ref = h_ref @ w2 + b2
    ref = jax.nn.log_softmax(logits_ref, axis=1)

    assert out.shape == (batch, num_classes)
    assert jnp.allclose(out, ref, atol=1e-5, rtol=1e-5)

    print("KERNEL_OK")
</pallas_src>

<mosaic_0001>
module attributes {stable_mosaic.version = 11 : i64} {
  func.func @kernel(%arg0: i32, %arg1: i32, %arg2: memref<2x8x32xf32, #tpu.memory_space<vmem>>, %arg3: memref<2x8x32xf32, #tpu.memory_space<vmem>>, %arg4: memref<32x32xf32, #tpu.memory_space<vmem>>, %arg5: memref<1x32xf32, #tpu.memory_space<vmem>>, %arg6: memref<32x128xf32, #tpu.memory_space<vmem>>, %arg7: memref<1x128xf32, #tpu.memory_space<vmem>>, %arg8: memref<2x128xf32, #tpu.memory_space<vmem>>, %arg9: memref<2x32xf32, #tpu.memory_space<vmem>>) attributes {dimension_semantics = [#tpu.dimension_semantics<parallel>, #tpu.dimension_semantics<arbitrary>], iteration_bounds = array<i64: 1, 1>, scalar_prefetch = 0 : i64, scratch_operands = 1 : i64, tpu.core_type = #tpu.core_type<tc>, window_params = [{transform_indices = @transform_0, window_bounds = array<i64: 2, 8, 32>}, {transform_indices = @transform_1, window_bounds = array<i64: 2, 8, 32>}, {pipeline_mode = #tpu.pipeline_mode<synchronous>, transform_indices = @transform_2, window_bounds = array<i64: 32, 32>}, {pipeline_mode = #tpu.pipeline_mode<synchronous>, transform_indices = @transform_3, window_bounds = array<i64: 1, 32>}, {pipeline_mode = #tpu.pipeline_mode<synchronous>, transform_indices = @transform_4, window_bounds = array<i64: 32, 128>}, {pipeline_mode = #tpu.pipeline_mode<synchronous>, transform_indices = @transform_5, window_bounds = array<i64: 1, 128>}, {transform_indices = @transform_6, window_bounds = array<i64: 2, 128>}]} {
    %c0_i32 = arith.constant 0 : i32
    %0 = arith.cmpi eq, %arg1, %c0_i32 : i32
    %1 = arith.extui %0 : i1 to i32
    %c0_i32_0 = arith.constant 0 : i32
    %2 = arith.cmpi ne, %1, %c0_i32_0 : i32
    scf.if %2 {
      %cst_17 = arith.constant -3.40282347E+38 : f32
      %16 = vector.broadcast %cst_17 : f32 to vector<2x32xf32>
      %c0_18 = arith.constant 0 : index
      %c0_19 = arith.constant 0 : index
      %17 = vector.load %arg9[%c0_18, %c0_19] : memref<2x32xf32, #tpu.memory_space<vmem>>, vector<2x32xf32>
      tpu.vector_store %arg9[%c0_18, %c0_19], %16 {strides = array<i32>} : memref<2x32xf32, #tpu.memory_space<vmem>>, vector<2x32xf32>,
    } else {
    }
    %c0 = arith.constant 0 : index
    %c0_1 = arith.constant 0 : index
    %c0_2 = arith.constant 0 : index
    %3 = vector.load %arg2[%c0, %c0_1, %c0_2] : memref<2x8x32xf32, #tpu.memory_space<vmem>>, vector<2x8x32xf32>
    %c0_3 = arith.constant 0 : index
    %c0_4 = arith.constant 0 : index
    %4 = vector.load %arg9[%c0_3, %c0_4] : memref<2x32xf32, #tpu.memory_space<vmem>>, vector<2x32xf32>
    %cst = arith.constant dense<0xFF800000> : vector<2x32xf32>
    %5 = vector.multi_reduction <maximumf>, %3, %cst [1] : vector<2x8x32xf32> to vector<2x32xf32>
    %6 = arith.maximumf %4, %5 : vector<2x32xf32>
    %c0_5 = arith.constant 0 : index
    %c0_6 = arith.constant 0 : index
    %7 = vector.load %arg9[%c0_5, %c0_6] : memref<2x32xf32, #tpu.memory_space<vmem>>, vector<2x32xf32>
    tpu.vector_store %arg9[%c0_5, %c0_6], %6 {strides = array<i32>} : memref<2x32xf32, #tpu.memory_space<vmem>>, vector<2x32xf32>,
    %c0_7 = arith.constant 0 : index
    %c0_8 = arith.constant 0 : index
    %c0_9 = arith.constant 0 : index
    %8 = vector.load %arg3[%c0_7, %c0_8, %c0_9] : memref<2x8x32xf32, #tpu.memory_space<vmem>>, vector<2x8x32xf32>
    %c0_10 = arith.constant 0 : index
    %c0_11 = arith.constant 0 : index
    %9 = vector.load %arg9[%c0_10, %c0_11] : memref<2x32xf32, #tpu.memory_space<vmem>>, vector<2x32xf32>
    %cst_12 = arith.constant dense<0xFF800000> : vector<2x32xf32>
    %10 = vector.multi_reduction <maximumf>, %8, %cst_12 [1] : vector<2x8x32xf32> to vector<2x32xf32>
    %11 = arith.maximumf %9, %10 : vector<2x32xf32>
    %c0_13 = arith.constant 0 : index
    %c0_14 = arith.constant 0 : index
    %12 = vector.load %arg9[%c0_13, %c0_14] : memref<2x32xf32, #tpu.memory_space<vmem>>, vector<2x32xf32>
    tpu.vector_store %arg9[%c0_13, %c0_14], %11 {strides = array<i32>} : memref<2x32xf32, #tpu.memory_space<vmem>>, vector<2x32xf32>,
    %c0_i32_15 = arith.constant 0 : i32
    %13 = arith.cmpi eq, %arg1, %c0_i32_15 : i32
    %14 = arith.extui %13 : i1 to i32
    %c0_i32_16 = arith.constant 0 : i32
    %15 = arith.cmpi ne, %14, %c0_i32_16 : i32
    scf.if %15 {
      %c0_17 = arith.constant 0 : index
      %c0_18 = arith.constant 0 : index
      %16 = vector.load %arg9[%c0_17, %c0_18] : memref<2x32xf32, #tpu.memory_space<vmem>>, vector<2x32xf32>
      %c0_19 = arith.constant 0 : index
      %c0_20 = arith.constant 0 : index
      %17 = vector.load %arg4[%c0_19, %c0_20] : memref<32x32xf32, #tpu.memory_space<vmem>>, vector<32x32xf32>
      %cst_21 = arith.constant dense<0.000000e+00> : vector<2x32xf32>
      %18 = tpu.matmul %16, %17, %cst_21 {dimension_numbers = #tpu.dot_dimension_numbers<[1], [0], [0], [1], [0, 0, 1, 1], [], []>} : vector<2x32xf32>, vector<32x32xf32>, vector<2x32xf32> -> vector<2x32xf32>
      %c0_22 = arith.constant 0 : index
      %c0_23 = arith.constant 0 : index
      %19 = vector.load %arg5[%c0_22, %c0_23] : memref<1x32xf32, #tpu.memory_space<vmem>>, vector<1x32xf32>
      %20 = vector.broadcast %19 : vector<1x32xf32> to vector<2x32xf32>
      %21 = arith.addf %18, %20 : vector<2x32xf32>
      %cst_24 = arith.constant 0.000000e+00 : f32
      %22 = vector.broadcast %cst_24 : f32 to vector<2x32xf32>
      %23 = arith.maximumf %21, %22 : vector<2x32xf32>
      %c0_25 = arith.constant 0 : index
      %c0_26 = arith.constant 0 : index
      %24 = vector.load %arg6[%c0_25, %c0_26] : memref<32x128xf32, #tpu.memory_space<vmem>>, vector<32x128xf32>
      %cst_27 = arith.constant dense<0.000000e+00> : vector<2x128xf32>
      %25 = tpu.matmul %23, %24, %cst_27 {dimension_numbers = #tpu.dot_dimension_numbers<[1], [0], [0], [1], [0, 0, 1, 1], [], []>} : vector<2x32xf32>, vector<32x128xf32>, vector<2x128xf32> -> vector<2x128xf32>
      %c0_28 = arith.constant 0 : index
      %c0_29 = arith.constant 0 : index
      %26 = vector.load %arg7[%c0_28, %c0_29] : memref<1x128xf32, #tpu.memory_space<vmem>>, vector<1x128xf32>
      %27 = vector.broadcast %26 : vector<1x128xf32> to vector<2x128xf32>
      %28 = arith.addf %25, %27 : vector<2x128xf32>
      %cst_30 = arith.constant dense<0xFF800000> : vector<2xf32>
      %29 = vector.multi_reduction <maximumf>, %28, %cst_30 [1] : vector<2x128xf32> to vector<2xf32>
      %30 = vector.shape_cast %29 : vector<2xf32> to vector<2x1xf32>
      %31 = vector.broadcast %30 : vector<2x1xf32> to vector<2x128xf32>
      %32 = arith.subf %28, %31 : vector<2x128xf32>
      %33 = math.exp %32 : vector<2x128xf32>
      %cst_31 = arith.constant dense<0.000000e+00> : vector<2xf32>
      %34 = vector.multi_reduction <add>, %33, %cst_31 [1] : vector<2x128xf32> to vector<2xf32>
      %35 = vector.shape_cast %34 : vector<2xf32> to vector<2x1xf32>
      %36 = math.log %35 : vector<2x1xf32>
      %37 = vector.broadcast %36 : vector<2x1xf32> to vector<2x128xf32>
      %38 = arith.subf %32, %37 : vector<2x128xf32>
      %c0_32 = arith.constant 0 : index
      %c0_33 = arith.constant 0 : index
      %39 = vector.load %arg8[%c0_32, %c0_33] : memref<2x128xf32, #tpu.memory_space<vmem>>, vector<2x128xf32>
      tpu.vector_store %arg8[%c0_32, %c0_33], %38 {strides = array<i32>} : memref<2x128xf32, #tpu.memory_space<vmem>>, vector<2x128xf32>,
    } else {
    }
    return
  }
  func.func @transform_0(%arg0: i32, %arg1: i32) -> (i32, i32, i32) {
    %c0_i32 = arith.constant 0 : i32
    %c0_i32_0 = arith.constant 0 : i32
    return %arg0, %arg1, %c0_i32 : i32, i32, i32
  }
  func.func @transform_1(%arg0: i32, %arg1: i32) -> (i32, i32, i32) {
    %c0_i32 = arith.constant 0 : i32
    %c0_i32_0 = arith.constant 0 : i32
    return %arg0, %arg1, %c0_i32 : i32, i32, i32
  }
  func.func @transform_2(%arg0: i32, %arg1: i32) -> (i32, i32) {
    %c0_i32 = arith.constant 0 : i32
    %c0_i32_0 = arith.constant 0 : i32
    %c0_i32_1 = arith.constant 0 : i32
    return %c0_i32, %c0_i32_0 : i32, i32
  }
  func.func @transform_3(%arg0: i32, %arg1: i32) -> (i32, i32) {
    %c0_i32 = arith.constant 0 : i32
    %c0_i32_0 = arith.constant 0 : i32
    %c0_i32_1 = arith.constant 0 : i32
    return %c0_i32, %c0_i32_0 : i32, i32
  }
  func.func @transform_4(%arg0: i32, %arg1: i32) -> (i32, i32) {
    %c0_i32 = arith.constant 0 : i32
    %c0_i32_0 = arith.constant 0 : i32
    %c0_i32_1 = arith.constant 0 : i32
    return %c0_i32, %c0_i32_0 : i32, i32
  }
  func.func @transform_5(%arg0: i32, %arg1: i32) -> (i32, i32) {
    %c0_i32 = arith.constant 0 : i32
    %c0_i32_0 = arith.constant 0 : i32
    %c0_i32_1 = arith.constant 0 : i32
    return %c0_i32, %c0_i32_0 : i32, i32
  }
  func.func @transform_6(%arg0: i32, %arg1: i32) -> (i32, i32) {
    %c0_i32 = arith.constant 0 : i32
    %c0_i32_0 = arith.constant 0 : i32
    return %arg0, %c0_i32 : i32, i32
  }
}

module attributes {stable_mosaic.version = 11 : i64} {
  func.func @kernel(%arg0: i32, %arg1: i32, %arg2: memref<2x8x32xf32, #tpu.memory_space<vmem>>, %arg3: memref<2x8x32xf32, #tpu.memory_space<vmem>>, %arg4: memref<32x32xf32, #tpu.memory_space<vmem>>, %arg5: memref<1x32xf32, #tpu.memory_space<vmem>>, %arg6: memref<32x128xf32, #tpu.memory_space<vmem>>, %arg7: memref<1x128xf32, #tpu.memory_space<vmem>>, %arg8: memref<2x128xf32, #tpu.memory_space<vmem>>, %arg9: memref<2x32xf32, #tpu.memory_space<vmem>>) attributes {dimension_semantics = [#tpu.dimension_semantics<parallel>, #tpu.dimension_semantics<arbitrary>], iteration_bounds = array<i64: 1, 1>, scalar_prefetch = 0 : i64, scratch_operands = 1 : i64, tpu.core_type = #tpu.core_type<tc>, window_params = [{transform_indices = @transform_0, window_bounds = array<i64: 2, 8, 32>}, {transform_indices = @transform_1, window_bounds = array<i64: 2, 8, 32>}, {pipeline_mode = #tpu.pipeline_mode<synchronous>, transform_indices = @transform_2, window_bounds = array<i64: 32, 32>}, {pipeline_mode = #tpu.pipeline_mode<synchronous>, transform_indices = @transform_3, window_bounds = array<i64: 1, 32>}, {pipeline_mode = #tpu.pipeline_mode<synchronous>, transform_indices = @transform_4, window_bounds = array<i64: 32, 128>}, {pipeline_mode = #tpu.pipeline_mode<synchronous>, transform_indices = @transform_5, window_bounds = array<i64: 1, 128>}, {transform_indices = @transform_6, window_bounds = array<i64: 2, 128>}]} {
    %c0_i32 = arith.constant 0 : i32
    %0 = arith.cmpi eq, %arg1, %c0_i32 : i32
    %1 = arith.extui %0 : i1 to i32
    %c0_i32_0 = arith.constant 0 : i32
    %2 = arith.cmpi ne, %1, %c0_i32_0 : i32
    scf.if %2 {
      %cst_17 = arith.constant -3.40282347E+38 : f32
      %16 = vector.broadcast %cst_17 : f32 to vector<2x32xf32>
      %c0_18 = arith.constant 0 : index
      %c0_19 = arith.constant 0 : index
      %17 = vector.load %arg9[%c0_18, %c0_19] : memref<2x32xf32, #tpu.memory_space<vmem>>, vector<2x32xf32>
      tpu.vector_store %arg9[%c0_18, %c0_19], %16 {strides = array<i32>} : memref<2x32xf32, #tpu.memory_space<vmem>>, vector<2x32xf32>,
    } else {
    }
    %c0 = arith.constant 0 : index
    %c0_1 = arith.constant 0 : index
    %c0_2 = arith.constant 0 : index
    %3 = vector.load %arg2[%c0, %c0_1, %c0_2] : memref<2x8x32xf32, #tpu.memory_space<vmem>>, vector<2x8x32xf32>
    %c0_3 = arith.constant 0 : index
    %c0_4 = arith.constant 0 : index
    %4 = vector.load %arg9[%c0_3, %c0_4] : memref<2x32xf32, #tpu.memory_space<vmem>>, vector<2x32xf32>
    %cst = arith.constant dense<0xFF800000> : vector<2x32xf32>
    %5 = vector.multi_reduction <maximumf>, %3, %cst [1] : vector<2x8x32xf32> to vector<2x32xf32>
    %6 = arith.maximumf %4, %5 : vector<2x32xf32>
    %c0_5 = arith.constant 0 : index
    %c0_6 = arith.constant 0 : index
    %7 = vector.load %arg9[%c0_5, %c0_6] : memref<2x32xf32, #tpu.memory_space<vmem>>, vector<2x32xf32>
    tpu.vector_store %arg9[%c0_5, %c0_6], %6 {strides = array<i32>} : memref<2x32xf32, #tpu.memory_space<vmem>>, vector<2x32xf32>,
    %c0_7 = arith.constant 0 : index
    %c0_8 = arith.constant 0 : index
    %c0_9 = arith.constant 0 : index
    %8 = vector.load %arg3[%c0_7, %c0_8, %c0_9] : memref<2x8x32xf32, #tpu.memory_space<vmem>>, vector<2x8x32xf32>
    %c0_10 = arith.constant 0 : index
    %c0_11 = arith.constant 0 : index
    %9 = vector.load %arg9[%c0_10, %c0_11] : memref<2x32xf32, #tpu.memory_space<vmem>>, vector<2x32xf32>
    %cst_12 = arith.constant dense<0xFF800000> : vector<2x32xf32>
    %10 = vector.multi_reduction <maximumf>, %8, %cst_12 [1] : vector<2x8x32xf32> to vector<2x32xf32>
    %11 = arith.maximumf %9, %10 : vector<2x32xf32>
    %c0_13 = arith.constant 0 : index
    %c0_14 = arith.constant 0 : index
    %12 = vector.load %arg9[%c0_13, %c0_14] : memref<2x32xf32, #tpu.memory_space<vmem>>, vector<2x32xf32>
    tpu.vector_store %arg9[%c0_13, %c0_14], %11 {strides = array<i32>} : memref<2x32xf32, #tpu.memory_space<vmem>>, vector<2x32xf32>,
    %c0_i32_15 = arith.constant 0 : i32
    %13 = arith.cmpi eq, %arg1, %c0_i32_15 : i32
    %14 = arith.extui %13 : i1 to i32
    %c0_i32_16 = arith.constant 0 : i32
    %15 = arith.cmpi ne, %14, %c0_i32_16 : i32
    scf.if %15 {
      %c0_17 = arith.constant 0 : index
      %c0_18 = arith.constant 0 : index
      %16 = vector.load %arg9[%c0_17, %c0_18] : memref<2x32xf32, #tpu.memory_space<vmem>>, vector<2x32xf32>
      %c0_19 = arith.constant 0 : index
      %c0_20 = arith.constant 0 : index
      %17 = vector.load %arg4[%c0_19, %c0_20] : memref<32x32xf32, #tpu.memory_space<vmem>>, vector<32x32xf32>
      %cst_21 = arith.constant dense<0.000000e+00> : vector<2x32xf32>
      %18 = tpu.matmul %16, %17, %cst_21 {dimension_numbers = #tpu.dot_dimension_numbers<[1], [0], [0], [1], [0, 0, 1, 1], [], []>} : vector<2x32xf32>, vector<32x32xf32>, vector<2x32xf32> -> vector<2x32xf32>
      %c0_22 = arith.constant 0 : index
      %c0_23 = arith.constant 0 : index
      %19 = vector.load %arg5[%c0_22, %c0_23] : memref<1x32xf32, #tpu.memory_space<vmem>>, vector<1x32xf32>
      %20 = vector.broadcast %19 : vector<1x32xf32> to vector<2x32xf32>
      %21 = arith.addf %18, %20 : vector<2x32xf32>
      %cst_24 = arith.constant 0.000000e+00 : f32
      %22 = vector.broadcast %cst_24 : f32 to vector<2x32xf32>
      %23 = arith.maximumf %21, %22 : vector<2x32xf32>
      %c0_25 = arith.constant 0 : index
      %c0_26 = arith.constant 0 : index
      %24 = vector.load %arg6[%c0_25, %c0_26] : memref<32x128xf32, #tpu.memory_space<vmem>>, vector<32x128xf32>
      %cst_27 = arith.constant dense<0.000000e+00> : vector<2x128xf32>
      %25 = tpu.matmul %23, %24, %cst_27 {dimension_numbers = #tpu.dot_dimension_numbers<[1], [0], [0], [1], [0, 0, 1, 1], [], []>} : vector<2x32xf32>, vector<32x128xf32>, vector<2x128xf32> -> vector<2x128xf32>
      %c0_28 = arith.constant 0 : index
      %c0_29 = arith.constant 0 : index
      %26 = vector.load %arg7[%c0_28, %c0_29] : memref<1x128xf32, #tpu.memory_space<vmem>>, vector<1x128xf32>
      %27 = vector.broadcast %26 : vector<1x128xf32> to vector<2x128xf32>
      %28 = arith.addf %25, %27 : vector<2x128xf32>
      %cst_30 = arith.constant dense<0xFF800000> : vector<2xf32>
      %29 = vector.multi_reduction <maximumf>, %28, %cst_30 [1] : vector<2x128xf32> to vector<2xf32>
      %30 = vector.shape_cast %29 : vector<2xf32> to vector<2x1xf32>
      %31 = vector.broadcast %30 : vector<2x1xf32> to vector<2x128xf32>
      %32 = arith.subf %28, %31 : vector<2x128xf32>
      %33 = math.exp %32 : vector<2x128xf32>
      %cst_31 = arith.constant dense<0.000000e+00> : vector<2xf32>
      %34 = vector.multi_reduction <add>, %33, %cst_31 [1] : vector<2x128xf32> to vector<2xf32>
      %35 = vector.shape_cast %34 : vector<2xf32> to vector<2x1xf32>
      %36 = math.log %35 : vector<2x1xf32>
      %37 = vector.broadcast %36 : vector<2x1xf32> to vector<2x128xf32>
      %38 = arith.subf %32, %37 : vector<2x128xf32>
      %c0_32 = arith.constant 0 : index
      %c0_33 = arith.constant 0 : index
      %39 = vector.load %arg8[%c0_32, %c0_33] : memref<2x128xf32, #tpu.memory_space<vmem>>, vector<2x128xf32>
      tpu.vector_store %arg8[%c0_32, %c0_33], %38 {strides = array<i32>} : memref<2x128xf32, #tpu.memory_space<vmem>>, vector<2x128xf32>,
    } else {
    }
    return
  }
  func.func @transform_0(%arg0: i32, %arg1: i32) -> (i32, i32, i32) {
    %c0_i32 = arith.constant 0 : i32
    %c0_i32_0 = arith.constant 0 : i32
    return %arg0, %arg1, %c0_i32 : i32, i32, i32
  }
  func.func @transform_1(%arg0: i32, %arg1: i32) -> (i32, i32, i32) {
    %c0_i32 = arith.constant 0 : i32
    %c0_i32_0 = arith.constant 0 : i32
    return %arg0, %arg1, %c0_i32 : i32, i32, i32
  }
  func.func @transform_2(%arg0: i32, %arg1: i32) -> (i32, i32) {
    %c0_i32 = arith.constant 0 : i32
    %c0_i32_0 = arith.constant 0 : i32
    %c0_i32_1 = arith.constant 0 : i32
    return %c0_i32, %c0_i32_0 : i32, i32
  }
  func.func @transform_3(%arg0: i32, %arg1: i32) -> (i32, i32) {
    %c0_i32 = arith.constant 0 : i32
    %c0_i32_0 = arith.constant 0 : i32
    %c0_i32_1 = arith.constant 0 : i32
    return %c0_i32, %c0_i32_0 : i32, i32
  }
  func.func @transform_4(%arg0: i32, %arg1: i32) -> (i32, i32) {
    %c0_i32 = arith.constant 0 : i32
    %c0_i32_0 = arith.constant 0 : i32
    %c0_i32_1 = arith.constant 0 : i32
    return %c0_i32, %c0_i32_0 : i32, i32
  }
  func.func @transform_5(%arg0: i32, %arg1: i32) -> (i32, i32) {
    %c0_i32 = arith.constant 0 : i32
    %c0_i32_0 = arith.constant 0 : i32
    %c0_i32_1 = arith.constant 0 : i32
    return %c0_i32, %c0_i32_0 : i32, i32
  }
  func.func @transform_6(%arg0: i32, %arg1: i32) -> (i32, i32) {
    %c0_i32 = arith.constant 0 : i32
    %c0_i32_0 = arith.constant 0 : i32
    return %arg0, %c0_i32 : i32, i32
  }
}

</mosaic_0001>

<bundles_post_ra>
// kernel: tpu_custom_call.1
= control target key start
LH: loop header
LB: loop body
LE: loop exit
PB: predicated region body
PF: predicated region fallthrough
CT: control target
= control target key end

     0   :  { %11 = vsyncpa [#allocation4], 0  ;;  %s666_s0 = inlined_call_operand.hbm [shape: f32[2,8,32], index: 0, kind: input, shape index: {}]   ;;  %s667_s1 = inlined_call_operand.hbm [shape: f32[2,8,32], index: 1, kind: input, shape index: {}]   ;;  %s668_s2 = inlined_call_operand.hbm [shape: f32[32,32], index: 2, kind: input, shape index: {}]   ;;  %s669_s3 = inlined_call_operand.vmem [shape: f32[1,32], index: 3, kind: input, shape index: {}]   ;;  %s670_s4 = inlined_call_operand.hbm [shape: f32[32,128], index: 4, kind: input, shape index: {}]   ;;  %s671_s5 = inlined_call_operand.vmem [shape: f32[1,128], index: 5, kind: input, shape index: {}]   ;;  %s672_s6 = inlined_call_operand.hbm [shape: f32[2,128], index: 6, kind: output, shape index: {}]  }
   0x1   :  { %12 = vsyncpa [#allocation7], 0 }
   0x2   :  { %13 = vsyncpa [#allocation10], 0 }
   0x3   :  { %14 = vsyncpa [#allocation5], 0  ;;  %s519_s21 = smov [#allocation6]   ;;  %s520_s23 = smov [#allocation3]  }
   0x4   :  { %s32_s22 = sshll.u32 %s519_s21, 4  ;;  %s20_s24 = sshll.u32 %s520_s23, 4  ;;  %s33_s22 = int_to_ptr.vmem [resolvable:$true] %s32_s22  ;;  %s565_s24 = int_to_ptr.vmem [resolvable:$true] %s20_s24 }
   0x5   :  { %s401_s27 = scalar_lea.hbm %s667_s1, 256 }
   0x6   :  { %p402_p0 = scmp.ne.s32.totalorder %s667_s1, %s401_s27  ;;  %p405_p1 = scmp.lt.u32.totalorder %s401_s27, %s667_s1 }
   0x8   :  { %p407_p2 = pnand %p405_p1, %p402_p0 }
   0xa   :  { %410 = shalt.err (!%p407_p2)
}
   0xb   :  { %s411_s8 = scalar_lea.vmem %s33_s22, 256  ;;  %p416_p4 = scmp.lt.s32.totalorder %s33_s22, %s33_s22 }
   0xc   :  { %p412_p3 = scmp.ne.s32.totalorder %s33_s22, %s411_s8  ;;  %p417_p5 = scmp.lt.s32.totalorder %s411_s8, %s411_s8 }
   0xe   :  { %p418_p6 = por %p417_p5, %p416_p4 }
  0x10   :  { %p419_p7 = pnand %p418_p6, %p412_p3 }
  0x12   :  { %422 = shalt.err (!%p419_p7)
}
  0x13   :  { %s521_s9 = smov 128   ;;  %s522_s10 = smov 8  }
  0x14   :  { %38 = dma.hbm_to_vmem [thread:$0]  %s667_s1, 256, %s33_s22, [#allocation7], %s521_s9, %s521_s9, %s522_s10  }
  0x15   :  { %s423_s15 = scalar_lea.hbm %s666_s0, 256 }
  0x16   :  { %p424_p8 = scmp.ne.s32.totalorder %s666_s0, %s423_s15  ;;  %p427_p9 = scmp.lt.u32.totalorder %s423_s15, %s666_s0 }
  0x18   :  { %p429_p10 = pnand %p427_p9, %p424_p8 }
  0x1a   :  { %432 = shalt.err (!%p429_p10)
}
  0x1b   :  { %s433_s20 = scalar_lea.vmem %s565_s24, 256  ;;  %p438_p12 = scmp.lt.s32.totalorder %s565_s24, %s565_s24 }
  0x1c   :  { %p434_p11 = scmp.ne.s32.totalorder %s565_s24, %s433_s20  ;;  %p439_p13 = scmp.lt.s32.totalorder %s433_s20, %s433_s20 }
  0x1e   :  { %p440_p0 = por %p439_p13, %p438_p12 }
  0x20   :  { %p441_p1 = pnand %p440_p0, %p434_p11 }
  0x22   :  { %444 = shalt.err (!%p441_p1)
}
  0x23   :  { %26 = dma.hbm_to_vmem [thread:$0]  %s666_s0, 256, %s565_s24, [#allocation4], %s521_s9, %s521_s9, %s522_s10  }
  0x24   :  { %s523_s22 = smov [#allocation8]   ;;  %s524_s25 = smov [#allocation9]  }
  0x25   :  { %s44_s23 = sshll.u32 %s523_s22, 4  ;;  %s58_s26 = sshll.u32 %s524_s25, 4  ;;  %s45_s23 = int_to_ptr.vmem [resolvable:$true] %s44_s23  ;;  %s602_s26 = int_to_ptr.vmem [resolvable:$true] %s58_s26 }
  0x26   :  { %s445_s29 = scalar_lea.hbm %s668_s2, 512 }
  0x27   :  { %p446_p2 = scmp.ne.s32.totalorder %s668_s2, %s445_s29  ;;  %p449_p3 = scmp.lt.u32.totalorder %s445_s29, %s668_s2 }
  0x29   :  { %p451_p4 = pnand %p449_p3, %p446_p2 }
  0x2b   :  { %454 = shalt.err (!%p451_p4)
}
  0x2c   :  { %s455_s0 = scalar_lea.vmem %s45_s23, 512  ;;  %p460_p6 = scmp.lt.s32.totalorder %s45_s23, %s45_s23 }
  0x2d   :  { %p456_p5 = scmp.ne.s32.totalorder %s45_s23, %s455_s0  ;;  %p461_p7 = scmp.lt.s32.totalorder %s455_s0, %s455_s0 }
  0x2f   :  { %p462_p8 = por %p461_p7, %p460_p6 }
  0x31   :  { %p463_p9 = pnand %p462_p8, %p456_p5 }
  0x33   :  { %466 = shalt.err (!%p463_p9)
}
  0x34   :  { %50 = dma.hbm_to_vmem [thread:$0]  %s668_s2, 512, %s45_s23, [#allocation7], %s521_s9, %s521_s9, %s522_s10  }
  0x35   :  { %s467_s15 = scalar_lea.hbm %s670_s4, 512 }
  0x36   :  { %p468_p10 = scmp.ne.s32.totalorder %s670_s4, %s467_s15  ;;  %p471_p11 = scmp.lt.u32.totalorder %s467_s15, %s670_s4 }
  0x38   :  { %p473_p12 = pnand %p471_p11, %p468_p10 }
  0x3a   :  { %476 = shalt.err (!%p473_p12)
}
  0x3b   :  { %s477_s20 = scalar_lea.vmem %s602_s26, 512  ;;  %p482_p0 = scmp.lt.s32.totalorder %s602_s26, %s602_s26 }
  0x3c   :  { %p478_p13 = scmp.ne.s32.totalorder %s602_s26, %s477_s20  ;;  %p483_p1 = scmp.lt.s32.totalorder %s477_s20, %s477_s20 }
  0x3e   :  { %p484_p2 = por %p483_p1, %p482_p0 }
  0x40   :  { %p485_p3 = pnand %p484_p2, %p478_p13 }
  0x42   :  { %488 = shalt.err (!%p485_p3)
}
  0x43   :  { %64 = dma.hbm_to_vmem [thread:$0]  %s670_s4, 512, %s602_s26, [#allocation10], %s521_s9, %s521_s9, %s522_s10  }
  0x44   :  { %511 = dma.done.wait [#allocation4], 256  }
  0x45   :  { %512 = vsyncadd [#allocation4], 4294967040 }
  0x46   :  { %513 = dma.done.wait [#allocation7], 768  }
  0x47   :  { %514 = vsyncadd [#allocation7], 4294966528 }
  0x48   :  { %515 = dma.done.wait [#allocation10], 512  }
  0x49   :  { %516 = vsyncadd [#allocation10], 4294966784  ;;  %vm83_vm0 = vcmask 254976   ;;  %v525_v0 = vmov 0.0|0.0   ;;  %vm526_vm1 = vmmov 0   ;;  %v527_v1 = vmov 0.0  }
  0x4a   :  { %374 = vmatprep.subr.bf16.mxu0 %v525_v0  ;;  %360 = vmatprep.mubr.msk.f32.mxu0 %vm526_vm1, %v527_v1  ;;  %v528_v2 = vmov -3.4028235e+38   ;;  %vm88_vm2 = vcmask 261120   ;;  %v138_v3 = vld [vmem:[#allocation8] sm:$0xff]  ;;  %v139_v4 = vld [vmem:[#allocation8 + $0x8] sm:$0xff]  ;;  %v140_v5 = vld [vmem:[#allocation8 + $0x10] sm:$0xff] }
  0x4b   :  { %84 = vst.msk [vmem:[#allocation2] sm:$0x3] %vm83_vm0, %v528_v2  ;;  %380 = vmatprep.subr.bf16.mxu1 %v525_v0  ;;  %371 = vmatprep.mubr.msk.f32.mxu1 %vm526_vm1, %v527_v1  ;;  %v375_v6 = vpack.c.bf16 %v139_v4, %v138_v3  ;;  %v141_v7 = vld [vmem:[#allocation8 + $0x18] sm:$0xff]  ;;  %v85_v8 = vld [vmem:[#allocation3] sm:$0xff]  ;;  %v86_v9 = vld [vmem:[#allocation3 + $0x8] sm:$0xff]  ;;  %vm105_vm3 = vcmask 1041409  }
  0x4c   :  { %v378_v10 = vpack.c.bf16 %v141_v7, %v140_v5  ;;  %v89_v11 = vsel %vm88_vm2, %v85_v8, -inf  ;;  %v96_v12 = vsel %vm88_vm2, %v86_v9, -inf  ;;  %v111_v13 = vld [vmem:[#allocation6] sm:$0xff]  ;;  %v112_v14 = vld [vmem:[#allocation6 + $0x8] sm:$0xff]  ;;  %v223_v19 = vld [vmem:[#allocation9] sm:$0xff]  ;;  %vm307_vm4 = vcmask 1041408  }
  0x4d   :  { %376 = vmatpush3.bf16.msra.mxu0 %v375_v6  ;;  %v90_v15 = vrot.slane %v89_v11, 4  ;;  %v97_v16 = vrot.slane %v96_v12, 4  ;;  %v114_v17 = vsel %vm88_vm2, %v111_v13, -inf  ;;  %v121_v18 = vsel %vm88_vm2, %v112_v14, -inf  ;;  %v224_v20 = vld [vmem:[#allocation9 + $0x8] sm:$0xff]  ;;  %v225_v51 = vld [vmem:[#allocation9 + $0x10] sm:$0xff] }
  0x4e   :  { %377 = vmatprep.subr.bf16.mxu0 %v525_v0  ;;  %v115_v21 = vrot.slane %v114_v17, 4  ;;  %v122_v22 = vrot.slane %v121_v18, 4  ;;  %v381_v23 = vpack.c.bf16 %v224_v20, %v223_v19  ;;  %v226_v52 = vld [vmem:[#allocation9 + $0x18] sm:$0xff] }
  0x4f   :  { %v91_v24 = vmax.f32 %v89_v11, %v90_v15  ;;  %v98_v25 = vmax.f32 %v96_v12, %v97_v16  ;;  %v384_v53 = vpack.c.bf16 %v226_v52, %v225_v51  ;;  %v338_v54 = vld [vmem:[%s669_s3] ss:$0 sm:$0xff]  ;;  %s529_s3 = smov [#allocation11]  }
  0x50   :  { %v116_v26 = vmax.f32 %v114_v17, %v115_v21  ;;  %v123_v27 = vmax.f32 %v121_v18, %v122_v22  ;;  %382 = vmatpush3.bf16.msra.mxu1 %v381_v23  ;;  %v340_v59 = vld [vmem:[%s671_s5] ss:$0 sm:$0xff]  ;;  %s327_s22 = sshll.u32 %s529_s3, 4  ;;  %s328_s22 = int_to_ptr.vmem [resolvable:$true] %s327_s22 }
  0x51   :  { %379 = vmatpush3.bf16.msra.mxu0 %v378_v10  ;;  %v92_v28 = vrot.slane %v91_v24, 2  ;;  %v99_v29 = vrot.slane %v98_v25, 2  ;;  %383 = vmatprep.subr.bf16.mxu1 %v525_v0  ;;  %s489_s5 = scalar_lea.vmem %s328_s22, 32  ;;  %p494_p5 = scmp.lt.s32.totalorder %s328_s22, %s328_s22 }
  0x52   :  { %v117_v30 = vrot.slane %v116_v26, 2  ;;  %v124_v31 = vrot.slane %v123_v27, 2  ;;  %v87_v38 = vld [vmem:[#allocation2] sm:$0x3]  ;;  %p490_p4 = scmp.ne.s32.totalorder %s328_s22, %s489_s5  ;;  %p495_p6 = scmp.lt.s32.totalorder %s489_s5, %s489_s5 }
  0x53   :  { %v93_v32 = vmax.f32 %v91_v24, %v92_v28  ;;  %v100_v33 = vmax.f32 %v98_v25, %v99_v29 }
  0x54   :  { %v118_v36 = vmax.f32 %v116_v26, %v117_v30  ;;  %v125_v37 = vmax.f32 %v123_v27, %v124_v31  ;;  %385 = vmatpush3.bf16.msra.mxu1 %v384_v53  ;;  %p496_p7 = por %p495_p6, %p494_p5 }
  0x55   :  { %v94_v34 = vrot.slane %v93_v32, 1  ;;  %v101_v35 = vrot.slane %v100_v33, 1 }
  0x56   :  { %v119_v42 = vrot.slane %v118_v36, 1  ;;  %v126_v43 = vrot.slane %v125_v37, 1  ;;  %p497_p8 = pnand %p496_p7, %p490_p4 }
  0x57   :  { %v95_v39 = vmax.f32 %v93_v32, %v94_v34  ;;  %v102_v40 = vmax.f32 %v100_v33, %v101_v35 }
  0x58   :  { %v120_v45 = vmax.f32 %v118_v36, %v119_v42  ;;  %v127_v46 = vmax.f32 %v125_v37, %v126_v43 }
  0x59   :  { %v106_v41 = vsel %vm105_vm3, %v102_v40, %v95_v39 }
  0x5a   :  { %v108_v44 = vmax.f32 %v87_v38, %v106_v41  ;;  %v130_v47 = vsel %vm105_vm3, %v127_v46, %v120_v45 }
  0x5c   :  { %110 = vst.msk [vmem:[#allocation2] sm:$0x3] %vm83_vm0, %v108_v44 }
  0x63   :  { %v113_v48 = vld [vmem:[#allocation2] sm:$0x3] }
  0x64   :  { %v132_v49 = vmax.f32 %v113_v48, %v130_v47 }
  0x66   :  { %133 = vst.msk [vmem:[#allocation2] sm:$0x3] %vm83_vm0, %v132_v49 }
  0x6d   :  { %v137_v50 = vld [vmem:[#allocation2] sm:$0x3] }
  0x6e   :  { %361 = vmatmul.mubr.msk.f32.vlgmr.msra.gmra.mrb[0].mxu0 %vm88_vm2, %v137_v50 }
 0x141   :  { %v218_v55 = vpop.f32.mrb[0].mxu0 }
 0x142   :  { %v219_v56 = vadd.f32 %v338_v54, %v218_v55  ;;  %v362_v57 = vpop.f32.mrb[1].mxu0 }
 0x144   :  { %v222_v58 = vmax.f32 %v219_v56, 0.0 }
 0x146   :  { %372 = vmatmul.mubr.msk.f32.vlgmr.msra.gmra.mrb[0].mxu1 %vm88_vm2, %v222_v58 }
 0x219   :  { %v303_v60 = vpop.f32.mrb[0].mxu1 }
 0x21a   :  { %v304_v61 = vadd.f32 %v340_v59, %v303_v60  ;;  %v373_v62 = vpop.f32.mrb[1].mxu1 }
 0x21c   :  { %v308_v63 = vsel %vm307_vm4, %v304_v61, -inf }
 0x21d   :  { %309 = vmax.xlane.f32.xlu0 %v308_v63 }
 0x2aa   :  { %v310_v0 = vpop.xlane.xlu0 %309 }
 0x2ab   :  { %v311_v1 = vsub.f32 %v304_v61, %v310_v0 }
 0x2ad   :  { %v312_v2 = vmul.f32 1.442695, %v311_v1 }
 0x2af   :  { %397 = vpow2.f32 %v312_v2 }
 0x2b9   :  { %v398_v3 = vpop.eup %397 }
 0x2ba   :  { %v314_v4 = vsel %vm307_vm4, %v398_v3, 0.0 }
 0x2bb   :  { %315 = vadd.xlane.f32.xlu0 %v314_v4 }
 0x348   :  { %v316_v5 = vpop.xlane.xlu0 %315 }
 0x349   :  { %399 = vlog2.f32 %v316_v5 }
 0x353   :  { %v400_v6 = vpop.eup %399 }
 0x354   :  { %v318_v7 = vmul.f32 0.6931472, %v400_v6 }
 0x356   :  { %v319_v8 = vsub.f32 %v311_v1, %v318_v7 }
 0x358   :  { %320 = vst [vmem:[#allocation11] sm:$0x3] %v319_v8 }
 0x359   :  { %500 = shalt.err (!%p497_p8)
}
 0x35a   :  { %s501_s26 = scalar_lea.hbm %s672_s6, 32 }
 0x35b   :  { %p502_p9 = scmp.ne.s32.totalorder %s672_s6, %s501_s26  ;;  %p505_p10 = scmp.lt.u32.totalorder %s501_s26, %s672_s6 }
 0x35d   :  { %p507_p11 = pnand %p505_p10, %p502_p9 }
 0x35f   :  { %510 = shalt.err (!%p507_p11)
}
 0x360   :  { %330 = dma.vmem_to_hbm [thread:$0]  %s328_s22, 32, %s672_s6, [#allocation5]  }
 0x361   :  { %517 = dma.done.wait [#allocation5], 32  }
 0x362   :  { %518 = vsyncadd [#allocation5], 4294967264 }
 0x363   :  { %334 = vsyncpa [#allocation4], 1 }
 0x364   :  { %335 = vsyncpa [#allocation7], 1 }
 0x365   :  { %336 = vsyncpa [#allocation10], 1 }
 0x366   :  { %337 = vsyncpa [#allocation5], 1 }

// kernel: tpu_custom_call.1
= control target key start
LH: loop header
LB: loop body
LE: loop exit
PB: predicated region body
PF: predicated region fallthrough
CT: control target
= control target key end

     0   :  { %11 = vsyncpa [#allocation4], 0  ;;  %s666_s0 = inlined_call_operand.hbm [shape: f32[2,8,32], index: 0, kind: input, shape index: {}]   ;;  %s667_s1 = inlined_call_operand.hbm [shape: f32[2,8,32], index: 1, kind: input, shape index: {}]   ;;  %s668_s2 = inlined_call_operand.hbm [shape: f32[32,32], index: 2, kind: input, shape index: {}]   ;;  %s669_s3 = inlined_call_operand.vmem [shape: f32[1,32], index: 3, kind: input, shape index: {}]   ;;  %s670_s4 = inlined_call_operand.hbm [shape: f32[32,128], index: 4, kind: input, shape index: {}]   ;;  %s671_s5 = inlined_call_operand.vmem [shape: f32[1,128], index: 5, kind: input, shape index: {}]   ;;  %s672_s6 = inlined_call_operand.hbm [shape: f32[2,128], index: 6, kind: output, shape index: {}]  }
   0x1   :  { %12 = vsyncpa [#allocation7], 0 }
   0x2   :  { %13 = vsyncpa [#allocation10], 0 }
   0x3   :  { %14 = vsyncpa [#allocation5], 0  ;;  %s519_s21 = smov [#allocation6]   ;;  %s520_s23 = smov [#allocation3]  }
   0x4   :  { %s32_s22 = sshll.u32 %s519_s21, 4  ;;  %s20_s24 = sshll.u32 %s520_s23, 4  ;;  %s33_s22 = int_to_ptr.vmem [resolvable:$true] %s32_s22  ;;  %s565_s24 = int_to_ptr.vmem [resolvable:$true] %s20_s24 }
   0x5   :  { %s401_s27 = scalar_lea.hbm %s667_s1, 256 }
   0x6   :  { %p402_p0 = scmp.ne.s32.totalorder %s667_s1, %s401_s27  ;;  %p405_p1 = scmp.lt.u32.totalorder %s401_s27, %s667_s1 }
   0x8   :  { %p407_p2 = pnand %p405_p1, %p402_p0 }
   0xa   :  { %410 = shalt.err (!%p407_p2)
}
   0xb   :  { %s411_s8 = scalar_lea.vmem %s33_s22, 256  ;;  %p416_p4 = scmp.lt.s32.totalorder %s33_s22, %s33_s22 }
   0xc   :  { %p412_p3 = scmp.ne.s32.totalorder %s33_s22, %s411_s8  ;;  %p417_p5 = scmp.lt.s32.totalorder %s411_s8, %s411_s8 }
   0xe   :  { %p418_p6 = por %p417_p5, %p416_p4 }
  0x10   :  { %p419_p7 = pnand %p418_p6, %p412_p3 }
  0x12   :  { %422 = shalt.err (!%p419_p7)
}
  0x13   :  { %s521_s9 = smov 128   ;;  %s522_s10 = smov 8  }
  0x14   :  { %38 = dma.hbm_to_vmem [thread:$0]  %s667_s1, 256, %s33_s22, [#allocation7], %s521_s9, %s521_s9, %s522_s10  }
  0x15   :  { %s423_s15 = scalar_lea.hbm %s666_s0, 256 }
  0x16   :  { %p424_p8 = scmp.ne.s32.totalorder %s666_s0, %s423_s15  ;;  %p427_p9 = scmp.lt.u32.totalorder %s423_s15, %s666_s0 }
  0x18   :  { %p429_p10 = pnand %p427_p9, %p424_p8 }
  0x1a   :  { %432 = shalt.err (!%p429_p10)
}
  0x1b   :  { %s433_s20 = scalar_lea.vmem %s565_s24, 256  ;;  %p438_p12 = scmp.lt.s32.totalorder %s565_s24, %s565_s24 }
  0x1c   :  { %p434_p11 = scmp.ne.s32.totalorder %s565_s24, %s433_s20  ;;  %p439_p13 = scmp.lt.s32.totalorder %s433_s20, %s433_s20 }
  0x1e   :  { %p440_p0 = por %p439_p13, %p438_p12 }
  0x20   :  { %p441_p1 = pnand %p440_p0, %p434_p11 }
  0x22   :  { %444 = shalt.err (!%p441_p1)
}
  0x23   :  { %26 = dma.hbm_to_vmem [thread:$0]  %s666_s0, 256, %s565_s24, [#allocation4], %s521_s9, %s521_s9, %s522_s10  }
  0x24   :  { %s523_s22 = smov [#allocation8]   ;;  %s524_s25 = smov [#allocation9]  }
  0x25   :  { %s44_s23 = sshll.u32 %s523_s22, 4  ;;  %s58_s26 = sshll.u32 %s524_s25, 4  ;;  %s45_s23 = int_to_ptr.vmem [resolvable:$true] %s44_s23  ;;  %s602_s26 = int_to_ptr.vmem [resolvable:$true] %s58_s26 }
  0x26   :  { %s445_s29 = scalar_lea.hbm %s668_s2, 512 }
  0x27   :  { %p446_p2 = scmp.ne.s32.totalorder %s668_s2, %s445_s29  ;;  %p449_p3 = scmp.lt.u32.totalorder %s445_s29, %s668_s2 }
  0x29   :  { %p451_p4 = pnand %p449_p3, %p446_p2 }
  0x2b   :  { %454 = shalt.err (!%p451_p4)
}
  0x2c   :  { %s455_s0 = scalar_lea.vmem %s45_s23, 512  ;;  %p460_p6 = scmp.lt.s32.totalorder %s45_s23, %s45_s23 }
  0x2d   :  { %p456_p5 = scmp.ne.s32.totalorder %s45_s23, %s455_s0  ;;  %p461_p7 = scmp.lt.s32.totalorder %s455_s0, %s455_s0 }
  0x2f   :  { %p462_p8 = por %p461_p7, %p460_p6 }
  0x31   :  { %p463_p9 = pnand %p462_p8, %p456_p5 }
  0x33   :  { %466 = shalt.err (!%p463_p9)
}
  0x34   :  { %50 = dma.hbm_to_vmem [thread:$0]  %s668_s2, 512, %s45_s23, [#allocation7], %s521_s9, %s521_s9, %s522_s10  }
  0x35   :  { %s467_s15 = scalar_lea.hbm %s670_s4, 512 }
  0x36   :  { %p468_p10 = scmp.ne.s32.totalorder %s670_s4, %s467_s15  ;;  %p471_p11 = scmp.lt.u32.totalorder %s467_s15, %s670_s4 }
  0x38   :  { %p473_p12 = pnand %p471_p11, %p468_p10 }
  0x3a   :  { %476 = shalt.err (!%p473_p12)
}
  0x3b   :  { %s477_s20 = scalar_lea.vmem %s602_s26, 512  ;;  %p482_p0 = scmp.lt.s32.totalorder %s602_s26, %s602_s26 }
  0x3c   :  { %p478_p13 = scmp.ne.s32.totalorder %s602_s26, %s477_s20  ;;  %p483_p1 = scmp.lt.s32.totalorder %s477_s20, %s477_s20 }
  0x3e   :  { %p484_p2 = por %p483_p1, %p482_p0 }
  0x40   :  { %p485_p3 = pnand %p484_p2, %p478_p13 }
  0x42   :  { %488 = shalt.err (!%p485_p3)
}
  0x43   :  { %64 = dma.hbm_to_vmem [thread:$0]  %s670_s4, 512, %s602_s26, [#allocation10], %s521_s9, %s521_s9, %s522_s10  }
  0x44   :  { %511 = dma.done.wait [#allocation4], 256  }
  0x45   :  { %512 = vsyncadd [#allocation4], 4294967040 }
  0x46   :  { %513 = dma.done.wait [#allocation7], 768  }
  0x47   :  { %514 = vsyncadd [#allocation7], 4294966528 }
  0x48   :  { %515 = dma.done.wait [#allocation10], 512  }
  0x49   :  { %516 = vsyncadd [#allocation10], 4294966784  ;;  %vm83_vm0 = vcmask 254976   ;;  %v525_v0 = vmov 0.0|0.0   ;;  %vm526_vm1 = vmmov 0   ;;  %v527_v1 = vmov 0.0  }
  0x4a   :  { %374 = vmatprep.subr.bf16.mxu0 %v525_v0  ;;  %360 = vmatprep.mubr.msk.f32.mxu0 %vm526_vm1, %v527_v1  ;;  %v528_v2 = vmov -3.4028235e+38   ;;  %vm88_vm2 = vcmask 261120   ;;  %v138_v3 = vld [vmem:[#allocation8] sm:$0xff]  ;;  %v139_v4 = vld [vmem:[#allocation8 + $0x8] sm:$0xff]  ;;  %v140_v5 = vld [vmem:[#allocation8 + $0x10] sm:$0xff] }
  0x4b   :  { %84 = vst.msk [vmem:[#allocation2] sm:$0x3] %vm83_vm0, %v528_v2  ;;  %380 = vmatprep.subr.bf16.mxu1 %v525_v0  ;;  %371 = vmatprep.mubr.msk.f32.mxu1 %vm526_vm1, %v527_v1  ;;  %v375_v6 = vpack.c.bf16 %v139_v4, %v138_v3  ;;  %v141_v7 = vld [vmem:[#allocation8 + $0x18] sm:$0xff]  ;;  %v85_v8 = vld [vmem:[#allocation3] sm:$0xff]  ;;  %v86_v9 = vld [vmem:[#allocation3 + $0x8] sm:$0xff]  ;;  %vm105_vm3 = vcmask 1041409  }
  0x4c   :  { %v378_v10 = vpack.c.bf16 %v141_v7, %v140_v5  ;;  %v89_v11 = vsel %vm88_vm2, %v85_v8, -inf  ;;  %v96_v12 = vsel %vm88_vm2, %v86_v9, -inf  ;;  %v111_v13 = vld [vmem:[#allocation6] sm:$0xff]  ;;  %v112_v14 = vld [vmem:[#allocation6 + $0x8] sm:$0xff]  ;;  %v223_v19 = vld [vmem:[#allocation9] sm:$0xff]  ;;  %vm307_vm4 = vcmask 1041408  }
  0x4d   :  { %376 = vmatpush3.bf16.msra.mxu0 %v375_v6  ;;  %v90_v15 = vrot.slane %v89_v11, 4  ;;  %v97_v16 = vrot.slane %v96_v12, 4  ;;  %v114_v17 = vsel %vm88_vm2, %v111_v13, -inf  ;;  %v121_v18 = vsel %vm88_vm2, %v112_v14, -inf  ;;  %v224_v20 = vld [vmem:[#allocation9 + $0x8] sm:$0xff]  ;;  %v225_v51 = vld [vmem:[#allocation9 + $0x10] sm:$0xff] }
  0x4e   :  { %377 = vmatprep.subr.bf16.mxu0 %v525_v0  ;;  %v115_v21 = vrot.slane %v114_v17, 4  ;;  %v122_v22 = vrot.slane %v121_v18, 4  ;;  %v381_v23 = vpack.c.bf16 %v224_v20, %v223_v19  ;;  %v226_v52 = vld [vmem:[#allocation9 + $0x18] sm:$0xff] }
  0x4f   :  { %v91_v24 = vmax.f32 %v89_v11, %v90_v15  ;;  %v98_v25 = vmax.f32 %v96_v12, %v97_v16  ;;  %v384_v53 = vpack.c.bf16 %v226_v52, %v225_v51  ;;  %v338_v54 = vld [vmem:[%s669_s3] ss:$0 sm:$0xff]  ;;  %s529_s3 = smov [#allocation11]  }
  0x50   :  { %v116_v26 = vmax.f32 %v114_v17, %v115_v21  ;;  %v123_v27 = vmax.f32 %v121_v18, %v122_v22  ;;  %382 = vmatpush3.bf16.msra.mxu1 %v381_v23  ;;  %v340_v59 = vld [vmem:[%s671_s5] ss:$0 sm:$0xff]  ;;  %s327_s22 = sshll.u32 %s529_s3, 4  ;;  %s328_s22 = int_to_ptr.vmem [resolvable:$true] %s327_s22 }
  0x51   :  { %379 = vmatpush3.bf16.msra.mxu0 %v378_v10  ;;  %v92_v28 = vrot.slane %v91_v24, 2  ;;  %v99_v29 = vrot.slane %v98_v25, 2  ;;  %383 = vmatprep.subr.bf16.mxu1 %v525_v0  ;;  %s489_s5 = scalar_lea.vmem %s328_s22, 32  ;;  %p494_p5 = scmp.lt.s32.totalorder %s328_s22, %s328_s22 }
  0x52   :  { %v117_v30 = vrot.slane %v116_v26, 2  ;;  %v124_v31 = vrot.slane %v123_v27, 2  ;;  %v87_v38 = vld [vmem:[#allocation2] sm:$0x3]  ;;  %p490_p4 = scmp.ne.s32.totalorder %s328_s22, %s489_s5  ;;  %p495_p6 = scmp.lt.s32.totalorder %s489_s5, %s489_s5 }
  0x53   :  { %v93_v32 = vmax.f32 %v91_v24, %v92_v28  ;;  %v100_v33 = vmax.f32 %v98_v25, %v99_v29 }
  0x54   :  { %v118_v36 = vmax.f32 %v116_v26, %v117_v30  ;;  %v125_v37 = vmax.f32 %v123_v27, %v124_v31  ;;  %385 = vmatpush3.bf16.msra.mxu1 %v384_v53  ;;  %p496_p7 = por %p495_p6, %p494_p5 }
  0x55   :  { %v94_v34 = vrot.slane %v93_v32, 1  ;;  %v101_v35 = vrot.slane %v100_v33, 1 }
  0x56   :  { %v119_v42 = vrot.slane %v118_v36, 1  ;;  %v126_v43 = vrot.slane %v125_v37, 1  ;;  %p497_p8 = pnand %p496_p7, %p490_p4 }
  0x57   :  { %v95_v39 = vmax.f32 %v93_v32, %v94_v34  ;;  %v102_v40 = vmax.f32 %v100_v33, %v101_v35 }
  0x58   :  { %v120_v45 = vmax.f32 %v118_v36, %v119_v42  ;;  %v127_v46 = vmax.f32 %v125_v37, %v126_v43 }
  0x59   :  { %v106_v41 = vsel %vm105_vm3, %v102_v40, %v95_v39 }
  0x5a   :  { %v108_v44 = vmax.f32 %v87_v38, %v106_v41  ;;  %v130_v47 = vsel %vm105_vm3, %v127_v46, %v120_v45 }
  0x5c   :  { %110 = vst.msk [vmem:[#allocation2] sm:$0x3] %vm83_vm0, %v108_v44 }
  0x63   :  { %v113_v48 = vld [vmem:[#allocation2] sm:$0x3] }
  0x64   :  { %v132_v49 = vmax.f32 %v113_v48, %v130_v47 }
  0x66   :  { %133 = vst.msk [vmem:[#allocation2] sm:$0x3] %vm83_vm0, %v132_v49 }
  0x6d   :  { %v137_v50 = vld [vmem:[#allocation2] sm:$0x3] }
  0x6e   :  { %361 = vmatmul.mubr.msk.f32.vlgmr.msra.gmra.mrb[0].mxu0 %vm88_vm2, %v137_v50 }
 0x141   :  { %v218_v55 = vpop.f32.mrb[0].mxu0 }
 0x142   :  { %v219_v56 = vadd.f32 %v338_v54, %v218_v55  ;;  %v362_v57 = vpop.f32.mrb[1].mxu0 }
 0x144   :  { %v222_v58 = vmax.f32 %v219_v56, 0.0 }
 0x146   :  { %372 = vmatmul.mubr.msk.f32.vlgmr.msra.gmra.mrb[0].mxu1 %vm88_vm2, %v222_v58 }
 0x219   :  { %v303_v60 = vpop.f32.mrb[0].mxu1 }
 0x21a   :  { %v304_v61 = vadd.f32 %v340_v59, %v303_v60  ;;  %v373_v62 = vpop.f32.mrb[1].mxu1 }
 0x21c   :  { %v308_v63 = vsel %vm307_vm4, %v304_v61, -inf }
 0x21d   :  { %309 = vmax.xlane.f32.xlu0 %v308_v63 }
 0x2aa   :  { %v310_v0 = vpop.xlane.xlu0 %309 }
 0x2ab   :  { %v311_v1 = vsub.f32 %v304_v61, %v310_v0 }
 0x2ad   :  { %v312_v2 = vmul.f32 1.442695, %v311_v1 }
 0x2af   :  { %397 = vpow2.f32 %v312_v2 }
 0x2b9   :  { %v398_v3 = vpop.eup %397 }
 0x2ba   :  { %v314_v4 = vsel %vm307_vm4, %v398_v3, 0.0 }
 0x2bb   :  { %315 = vadd.xlane.f32.xlu0 %v314_v4 }
 0x348   :  { %v316_v5 = vpop.xlane.xlu0 %315 }
 0x349   :  { %399 = vlog2.f32 %v316_v5 }
 0x353   :  { %v400_v6 = vpop.eup %399 }
 0x354   :  { %v318_v7 = vmul.f32 0.6931472, %v400_v6 }
 0x356   :  { %v319_v8 = vsub.f32 %v311_v1, %v318_v7 }
 0x358   :  { %320 = vst [vmem:[#allocation11] sm:$0x3] %v319_v8 }
 0x359   :  { %500 = shalt.err (!%p497_p8)
}
 0x35a   :  { %s501_s26 = scalar_lea.hbm %s672_s6, 32 }
 0x35b   :  { %p502_p9 = scmp.ne.s32.totalorder %s672_s6, %s501_s26  ;;  %p505_p10 = scmp.lt.u32.totalorder %s501_s26, %s672_s6 }
 0x35d   :  { %p507_p11 = pnand %p505_p10, %p502_p9 }
 0x35f   :  { %510 = shalt.err (!%p507_p11)
}
 0x360   :  { %330 = dma.vmem_to_hbm [thread:$0]  %s328_s22, 32, %s672_s6, [#allocation5]  }
 0x361   :  { %517 = dma.done.wait [#allocation5], 32  }
 0x362   :  { %518 = vsyncadd [#allocation5], 4294967264 }
 0x363   :  { %334 = vsyncpa [#allocation4], 1 }
 0x364   :  { %335 = vsyncpa [#allocation7], 1 }
 0x365   :  { %336 = vsyncpa [#allocation10], 1 }
 0x366   :  { %337 = vsyncpa [#allocation5], 1 }

</bundles_post_ra>
